<compile_context>
chip_gen: v7x
topology: tpu7x:2x2x1
jax: 0.10.0
libtpu: 0.0.40
codegen_flags: <defaults>
</compile_context>

<pallas_src>
import functools

import jax
import jax.numpy as jnp
from jax import lax
from jax.experimental import pallas as pl
from jax.experimental.pallas import tpu as pltpu


def _dice_kernel(x_ref, lab_ref, loss_ref, inter_acc, p_acc, o_acc, *,
                 smooth, hw, tile_pix, needs_mask):
    """One grid step over a (C, tile_pix) channel-major tile of pixels.

    x_ref    : (C, tile_pix) logits tile (VMEM), pixels on the lane axis
    lab_ref  : (1, tile_pix) int32 labels tile (VMEM)
    loss_ref : (1, 1) float32 final loss (SMEM), written on the last step
    *_acc    : (1, tile_pix) float32 VMEM lane accumulators
               (intersection / sum(softmax) / sum(one_hot))
    """
    n = pl.program_id(0)
    t = pl.program_id(1)

    @pl.when(jnp.logical_and(n == 0, t == 0))
    def _():
        inter_acc[...] = jnp.zeros_like(inter_acc)
        p_acc[...] = jnp.zeros_like(p_acc)
        o_acc[...] = jnp.zeros_like(o_acc)

    x = x_ref[...].astype(jnp.float32)            # (C, T)
    lab = lab_ref[...]                            # (1, T) int32
    C = x.shape[0]

    if needs_mask:
        # mask lanes past the true pixel count (partial last tile); also
        # guards against stale-VMEM garbage (inf/nan) entering the softmax.
        pix = t * tile_pix + lax.broadcasted_iota(jnp.int32, (1, tile_pix), 1)
        valid_b = pix < hw                        # (1, T) bool
        valid_f = valid_b.astype(jnp.float32)
        x = jnp.where(valid_b, x, 0.0)

    # softmax over channels (sublane axis 0)
    m = jnp.max(x, axis=0, keepdims=True)         # (1, T)
    e = jnp.exp(x - m)                            # (C, T)
    s = jnp.sum(e, axis=0, keepdims=True)         # (1, T)
    p = e * pl.reciprocal(s, approx=False)        # (C, T), EUP reciprocal

    # one-hot(target) over C classes (no scatter needed)
    class_ids = lax.broadcasted_iota(jnp.int32, x.shape, 0)
    onehot = (class_ids == lab).astype(jnp.float32)   # (C, T)

    if needs_mask:
        p = p * valid_f
        onehot = onehot * valid_f

    # per-lane partial sums (cheap sublane reductions over C); no cross-lane
    # reduce and no SMEM scalar RMW inside the hot loop.
    inter_acc[...] += jnp.sum(p * onehot, axis=0, keepdims=True)
    p_acc[...] += jnp.sum(p, axis=0, keepdims=True)
    o_acc[...] += jnp.sum(onehot, axis=0, keepdims=True)

    @pl.when(jnp.logical_and(n == pl.num_programs(0) - 1,
                             t == pl.num_programs(1) - 1))
    def _():
        inter = jnp.sum(inter_acc[...])
        denom = jnp.sum(p_acc[...]) + jnp.sum(o_acc[...]) + smooth
        loss_ref[0, 0] = 1.0 - (2.0 * inter + smooth) / denom


@functools.partial(jax.jit, static_argnames=("smooth", "ignore_index"))
def dice_loss(output, target, smooth=1.0, ignore_index=-1):
    """Pallas implementation of the softmax-dice loss.

    output: (N, C, H, W) float logits (NCHW, as in PyTorch)
    target: (N, H, W) int labels
    """
    N, C, H, W = output.shape
    HW = H * W
    target = target.astype(jnp.int32)

    # ignore_index handling (mirrors the PyTorch data-dependent branch);
    # fused into the same jit as the kernel so it is one device program.
    tmin = jnp.min(target)
    tmax = jnp.max(target)
    in_range = jnp.logical_and(tmin <= ignore_index, ignore_index < tmax)
    replace = jnp.logical_and(jnp.logical_not(in_range), target == ignore_index)
    target = jnp.where(replace, tmin, target)

    # free views: logits stay NCHW, labels get a unit sublane dim
    x = output.reshape(N, C, HW)
    lab = target.reshape(N, 1, HW)

    # pixel tile: multiple of 128 (or the full pixel dim), sized so the
    # double-buffered input blocks stay well below the scoped-VMEM limit on
    # all generations (v5e: 16 MiB default, v6e: 32 MiB, v7x: 32/64 MiB).
    bytes_per_pix = 4 * (C + 1)
    cap = (2 * 1024 * 1024) // bytes_per_pix
    cap = max(128, min(8192, (cap // 128) * 128))
    tile_pix = HW if HW <= cap else cap
    n_tiles = pl.cdiv(HW, tile_pix)
    needs_mask = (HW % tile_pix) != 0

    kernel = functools.partial(
        _dice_kernel, smooth=float(smooth), hw=HW,
        tile_pix=tile_pix, needs_mask=needs_mask)

    loss = pl.pallas_call(
        kernel,
        out_shape=jax.ShapeDtypeStruct((1, 1), jnp.float32),
        grid_spec=pltpu.PrefetchScalarGridSpec(
            num_scalar_prefetch=0,
            grid=(N, n_tiles),
            in_specs=[
                pl.BlockSpec((None, C, tile_pix), lambda n, t: (n, 0, t)),
                pl.BlockSpec((None, 1, tile_pix), lambda n, t: (n, 0, t)),
            ],
            out_specs=pl.BlockSpec(memory_space=pltpu.MemorySpace.SMEM),
            scratch_shapes=[
                pltpu.VMEM((1, tile_pix), jnp.float32),   # intersection
                pltpu.VMEM((1, tile_pix), jnp.float32),   # sum(softmax)
                pltpu.VMEM((1, tile_pix), jnp.float32),   # sum(one_hot)
            ],
        ),
        compiler_params=pltpu.CompilerParams(
            dimension_semantics=("arbitrary", "arbitrary"),
            vmem_limit_bytes=32 * 1024 * 1024,
        ),
    )(x, lab)

    return loss[0, 0]


def _reference_dice_loss(output, target, smooth=1.0, ignore_index=-1):
    """Pure-JAX reference matching the previously-reviewed semantics."""
    target = target.astype(jnp.int32)
    tmin = jnp.min(target)
    tmax = jnp.max(target)
    in_range = jnp.logical_and(tmin <= ignore_index, ignore_index < tmax)
    target = jnp.where(
        jnp.logical_and(jnp.logical_not(in_range), target == ignore_index), tmin, target
    )
    C = output.shape[1]
    onehot = jax.nn.one_hot(target, C, axis=1, dtype=jnp.float32)  # (N, C, H, W)
    p = jax.nn.softmax(output.astype(jnp.float32), axis=1)
    inter = jnp.sum(p * onehot)
    return 1.0 - (2.0 * inter + smooth) / (jnp.sum(p) + jnp.sum(onehot) + smooth)


if __name__ == "__main__":
    key = jax.random.PRNGKey(0)
    k1, k2 = jax.random.split(key)

    N, C, H, W = 2, 4, 16, 16
    output = jax.random.normal(k1, (N, C, H, W), dtype=jnp.float32)
    target = jax.random.randint(k2, (N, H, W), minval=0, maxval=C, dtype=jnp.int32)

    loss = dice_loss(output, target, smooth=1.0, ignore_index=-1)
    loss = jax.block_until_ready(loss)

    ref = _reference_dice_loss(output, target, smooth=1.0, ignore_index=-1)
    assert jnp.allclose(loss, ref, rtol=1e-5, atol=1e-6), (loss, ref)

    print("KERNEL_OK")
</pallas_src>

<mosaic_0001>
module attributes {stable_mosaic.version = 11 : i64} {
  func.func @_dice_kernel(%arg0: i32, %arg1: i32, %arg2: memref<1x4x256xf32, #tpu.memory_space<vmem>>, %arg3: memref<1x1x256xi32, #tpu.memory_space<vmem>>, %arg4: memref<1x1xf32, #tpu.memory_space<smem>>, %arg5: memref<1x256xf32, #tpu.memory_space<vmem>>, %arg6: memref<1x256xf32, #tpu.memory_space<vmem>>, %arg7: memref<1x256xf32, #tpu.memory_space<vmem>>) attributes {dimension_semantics = [#tpu.dimension_semantics<arbitrary>, #tpu.dimension_semantics<arbitrary>], iteration_bounds = array<i64: 2, 1>, scalar_prefetch = 0 : i64, scratch_operands = 3 : i64, tpu.core_type = #tpu.core_type<tc>, window_params = [{transform_indices = @transform_0, window_bounds = array<i64: 1, 4, 256>}, {transform_indices = @transform_1, window_bounds = array<i64: 1, 1, 256>}, {transform_indices = @transform_2, window_bounds = array<i64: 1, 1>}]} {
    %c0_i32 = arith.constant 0 : i32
    %0 = arith.cmpi eq, %arg0, %c0_i32 : i32
    %c0_i32_0 = arith.constant 0 : i32
    %1 = arith.cmpi eq, %arg1, %c0_i32_0 : i32
    %2 = arith.andi %0, %1 : i1
    %3 = arith.extui %2 : i1 to i32
    %c0_i32_1 = arith.constant 0 : i32
    %4 = arith.cmpi ne, %3, %c0_i32_1 : i32
    scf.if %4 {
      %cst_25 = arith.constant 0.000000e+00 : f32
      %45 = vector.broadcast %cst_25 : f32 to vector<1x256xf32>
      %c0_26 = arith.constant 0 : index
      %c0_27 = arith.constant 0 : index
      %46 = vector.load %arg5[%c0_26, %c0_27] : memref<1x256xf32, #tpu.memory_space<vmem>>, vector<1x256xf32>
      tpu.vector_store %arg5[%c0_26, %c0_27], %45 {strides = array<i32>} : memref<1x256xf32, #tpu.memory_space<vmem>>, vector<1x256xf32>,
      %cst_28 = arith.constant 0.000000e+00 : f32
      %47 = vector.broadcast %cst_28 : f32 to vector<1x256xf32>
      %c0_29 = arith.constant 0 : index
      %c0_30 = arith.constant 0 : index
      %48 = vector.load %arg6[%c0_29, %c0_30] : memref<1x256xf32, #tpu.memory_space<vmem>>, vector<1x256xf32>
      tpu.vector_store %arg6[%c0_29, %c0_30], %47 {strides = array<i32>} : memref<1x256xf32, #tpu.memory_space<vmem>>, vector<1x256xf32>,
      %cst_31 = arith.constant 0.000000e+00 : f32
      %49 = vector.broadcast %cst_31 : f32 to vector<1x256xf32>
      %c0_32 = arith.constant 0 : index
      %c0_33 = arith.constant 0 : index
      %50 = vector.load %arg7[%c0_32, %c0_33] : memref<1x256xf32, #tpu.memory_space<vmem>>, vector<1x256xf32>
      tpu.vector_store %arg7[%c0_32, %c0_33], %49 {strides = array<i32>} : memref<1x256xf32, #tpu.memory_space<vmem>>, vector<1x256xf32>,
    } else {
    }
    %c0 = arith.constant 0 : index
    %c0_2 = arith.constant 0 : index
    %c0_3 = arith.constant 0 : index
    %5 = vector.load %arg2[%c0, %c0_2, %c0_3] : memref<1x4x256xf32, #tpu.memory_space<vmem>>, vector<1x4x256xf32>
    %6 = vector.shape_cast %5 : vector<1x4x256xf32> to vector<4x256xf32>
    %c0_4 = arith.constant 0 : index
    %c0_5 = arith.constant 0 : index
    %c0_6 = arith.constant 0 : index
    %7 = vector.load %arg3[%c0_4, %c0_5, %c0_6] : memref<1x1x256xi32, #tpu.memory_space<vmem>>, vector<1x1x256xi32>
    %8 = vector.shape_cast %7 : vector<1x1x256xi32> to vector<1x256xi32>
    %cst = arith.constant dense<0xFF800000> : vector<256xf32>
    %9 = vector.multi_reduction <maximumf>, %6, %cst [0] : vector<4x256xf32> to vector<256xf32>
    %10 = vector.shape_cast %9 : vector<256xf32> to vector<1x256xf32>
    %11 = vector.broadcast %10 : vector<1x256xf32> to vector<4x256xf32>
    %12 = arith.subf %6, %11 : vector<4x256xf32>
    %13 = math.exp %12 : vector<4x256xf32>
    %cst_7 = arith.constant dense<0.000000e+00> : vector<256xf32>
    %14 = vector.multi_reduction <add>, %13, %cst_7 [0] : vector<4x256xf32> to vector<256xf32>
    %15 = vector.shape_cast %14 : vector<256xf32> to vector<1x256xf32>
    %16 = tpu.reciprocal %15 : vector<1x256xf32> -> vector<1x256xf32>
    %17 = vector.broadcast %16 : vector<1x256xf32> to vector<4x256xf32>
    %18 = arith.mulf %13, %17 : vector<4x256xf32>
    %19 = tpu.iota {dimensions = array<i32: 0>} : vector<4x256xi32>
    %20 = vector.broadcast %8 : vector<1x256xi32> to vector<4x256xi32>
    %21 = arith.cmpi eq, %19, %20 : vector<4x256xi32>
    %22 = arith.extui %21 : vector<4x256xi1> to vector<4x256xi32>
    %23 = arith.sitofp %22 : vector<4x256xi32> to vector<4x256xf32>
    %c0_8 = arith.constant 0 : index
    %c0_9 = arith.constant 0 : index
    %24 = vector.load %arg5[%c0_8, %c0_9] : memref<1x256xf32, #tpu.memory_space<vmem>>, vector<1x256xf32>
    %25 = arith.mulf %18, %23 : vector<4x256xf32>
    %cst_10 = arith.constant dense<0.000000e+00> : vector<256xf32>
    %26 = vector.multi_reduction <add>, %25, %cst_10 [0] : vector<4x256xf32> to vector<256xf32>
    %27 = vector.shape_cast %26 : vector<256xf32> to vector<1x256xf32>
    %28 = arith.addf %24, %27 : vector<1x256xf32>
    %c0_11 = arith.constant 0 : index
    %c0_12 = arith.constant 0 : index
    %29 = vector.load %arg5[%c0_11, %c0_12] : memref<1x256xf32, #tpu.memory_space<vmem>>, vector<1x256xf32>
    tpu.vector_store %arg5[%c0_11, %c0_12], %28 {strides = array<i32>} : memref<1x256xf32, #tpu.memory_space<vmem>>, vector<1x256xf32>,
    %c0_13 = arith.constant 0 : index
    %c0_14 = arith.constant 0 : index
    %30 = vector.load %arg6[%c0_13, %c0_14] : memref<1x256xf32, #tpu.memory_space<vmem>>, vector<1x256xf32>
    %cst_15 = arith.constant dense<0.000000e+00> : vector<256xf32>
    %31 = vector.multi_reduction <add>, %18, %cst_15 [0] : vector<4x256xf32> to vector<256xf32>
    %32 = vector.shape_cast %31 : vector<256xf32> to vector<1x256xf32>
    %33 = arith.addf %30, %32 : vector<1x256xf32>
    %c0_16 = arith.constant 0 : index
    %c0_17 = arith.constant 0 : index
    %34 = vector.load %arg6[%c0_16, %c0_17] : memref<1x256xf32, #tpu.memory_space<vmem>>, vector<1x256xf32>
    tpu.vector_store %arg6[%c0_16, %c0_17], %33 {strides = array<i32>} : memref<1x256xf32, #tpu.memory_space<vmem>>, vector<1x256xf32>,
    %c0_18 = arith.constant 0 : index
    %c0_19 = arith.constant 0 : index
    %35 = vector.load %arg7[%c0_18, %c0_19] : memref<1x256xf32, #tpu.memory_space<vmem>>, vector<1x256xf32>
    %cst_20 = arith.constant dense<0.000000e+00> : vector<256xf32>
    %36 = vector.multi_reduction <add>, %23, %cst_20 [0] : vector<4x256xf32> to vector<256xf32>
    %37 = vector.shape_cast %36 : vector<256xf32> to vector<1x256xf32>
    %38 = arith.addf %35, %37 : vector<1x256xf32>
    %c0_21 = arith.constant 0 : index
    %c0_22 = arith.constant 0 : index
    %39 = vector.load %arg7[%c0_21, %c0_22] : memref<1x256xf32, #tpu.memory_space<vmem>>, vector<1x256xf32>
    tpu.vector_store %arg7[%c0_21, %c0_22], %38 {strides = array<i32>} : memref<1x256xf32, #tpu.memory_space<vmem>>, vector<1x256xf32>,
    %c1_i32 = arith.constant 1 : i32
    %40 = arith.cmpi eq, %arg0, %c1_i32 : i32
    %c0_i32_23 = arith.constant 0 : i32
    %41 = arith.cmpi eq, %arg1, %c0_i32_23 : i32
    %42 = arith.andi %40, %41 : i1
    %43 = arith.extui %42 : i1 to i32
    %c0_i32_24 = arith.constant 0 : i32
    %44 = arith.cmpi ne, %43, %c0_i32_24 : i32
    scf.if %44 {
      %c0_25 = arith.constant 0 : index
      %c0_26 = arith.constant 0 : index
      %45 = vector.load %arg5[%c0_25, %c0_26] : memref<1x256xf32, #tpu.memory_space<vmem>>, vector<1x256xf32>
      %46 = vector.shape_cast %45 : vector<1x256xf32> to vector<1x1x256xf32>
      %cst_27 = arith.constant dense<0.000000e+00> : vector<1xf32>
      %47 = vector.multi_reduction <add>, %46, %cst_27 [1, 2] : vector<1x1x256xf32> to vector<1xf32>
      %48 = vector.shape_cast %47 : vector<1xf32> to vector<1x1x1xf32>
      %49 = vector.extract %48[0, 0, 0] : f32 from vector<1x1x1xf32>
      %c0_28 = arith.constant 0 : index
      %c0_29 = arith.constant 0 : index
      %50 = vector.load %arg6[%c0_28, %c0_29] : memref<1x256xf32, #tpu.memory_space<vmem>>, vector<1x256xf32>
      %51 = vector.shape_cast %50 : vector<1x256xf32> to vector<1x1x256xf32>
      %cst_30 = arith.constant dense<0.000000e+00> : vector<1xf32>
      %52 = vector.multi_reduction <add>, %51, %cst_30 [1, 2] : vector<1x1x256xf32> to vector<1xf32>
      %53 = vector.shape_cast %52 : vector<1xf32> to vector<1x1x1xf32>
      %54 = vector.extract %53[0, 0, 0] : f32 from vector<1x1x1xf32>
      %c0_31 = arith.constant 0 : index
      %c0_32 = arith.constant 0 : index
      %55 = vector.load %arg7[%c0_31, %c0_32] : memref<1x256xf32, #tpu.memory_space<vmem>>, vector<1x256xf32>
      %56 = vector.shape_cast %55 : vector<1x256xf32> to vector<1x1x256xf32>
      %cst_33 = arith.constant dense<0.000000e+00> : vector<1xf32>
      %57 = vector.multi_reduction <add>, %56, %cst_33 [1, 2] : vector<1x1x256xf32> to vector<1xf32>
      %58 = vector.shape_cast %57 : vector<1xf32> to vector<1x1x1xf32>
      %59 = vector.extract %58[0, 0, 0] : f32 from vector<1x1x1xf32>
      %60 = arith.addf %54, %59 : f32
      %cst_34 = arith.constant 1.000000e+00 : f32
      %61 = arith.addf %60, %cst_34 : f32
      %cst_35 = arith.constant 2.000000e+00 : f32
      %62 = arith.mulf %cst_35, %49 : f32
      %cst_36 = arith.constant 1.000000e+00 : f32
      %63 = arith.addf %62, %cst_36 : f32
      %64 = arith.divf %63, %61 : f32
      %cst_37 = arith.constant 1.000000e+00 : f32
      %65 = arith.subf %cst_37, %64 : f32
      %c0_38 = arith.constant 0 : index
      %c0_39 = arith.constant 0 : index
      %66 = memref.load %arg4[%c0_38, %c0_39] : memref<1x1xf32, #tpu.memory_space<smem>>
      memref.store %65, %arg4[%c0_38, %c0_39] : memref<1x1xf32, #tpu.memory_space<smem>>
    } else {
    }
    return
  }
  func.func @transform_0(%arg0: i32, %arg1: i32) -> (i32, i32, i32) {
    %c0_i32 = arith.constant 0 : i32
    %c0_i32_0 = arith.constant 0 : i32
    return %arg0, %c0_i32, %arg1 : i32, i32, i32
  }
  func.func @transform_1(%arg0: i32, %arg1: i32) -> (i32, i32, i32) {
    %c0_i32 = arith.constant 0 : i32
    %c0_i32_0 = arith.constant 0 : i32
    return %arg0, %c0_i32, %arg1 : i32, i32, i32
  }
  func.func @transform_2(%arg0: i32, %arg1: i32) -> (i32, i32) {
    %c0_i32 = arith.constant 0 : i32
    %c0_i32_0 = arith.constant 0 : i32
    %c0_i32_1 = arith.constant 0 : i32
    return %c0_i32, %c0_i32_0 : i32, i32
  }
}

</mosaic_0001>

<bundles_post_ra>
// kernel: dice_loss.1
= control target key start
LH: loop header
LB: loop body
LE: loop exit
PB: predicated region body
PF: predicated region fallthrough
CT: control target
= control target key end

     0   :  { %7 = vsyncpa [#allocation6], 0  ;;  %s683_s9 = smov 0   ;;  %s685_s10 = smov 0   ;;  %s785_s0 = inlined_call_operand.vmem [shape: f32[2,4,256], index: 0, kind: input, shape index: {}]   ;;  %s786_s1 = inlined_call_operand.vmem [shape: s32[2,1,256], index: 1, kind: input, shape index: {}]   ;;  %s787_s2 = inlined_call_operand.hbm [shape: f32[1,1], index: 2, kind: output, shape index: {}]  }
   0x1   :  { %s687_s11 = smov 0  }
   0x2 LB: > { %s555_s12 = sadd.s32 4294967295, %s662_s11   ;;  %s25_s13 = sadd.s32 1, %s658_s10  ;;  %s662_s11 = sphi %s687_s11, %s13_s11   ;;  %s658_s10 = sphi %s685_s10, %s791_s10   ;;  %s654_s9 = sphi %s683_s9, %s790_s9  }
   0x3   : > { %p27_p0 = scmp.ge.s32.totalorder %s25_s13, 2  ;;  %p558_p1 = scmp.ge.s32.totalorder %s662_s11, 1 }
   0x4   : > { %p143_p2 = scmp.lt.s32.totalorder %s662_s11, 3 }
   0x5   : > { %s793_s13 = smov (%p27_p0, %s25_s13), 0 }
   0x6   : > { %p144_p3 = pnand %p558_p1, %p143_p2 }
   0x7   : > { %p173_p4 = scmp.lt.s32.totalorder (!%p144_p3), %s654_s9, 1  ;;  %p191_p5 = scmp.eq.s32.totalorder (!%p144_p3), %s654_s9, 0 }
   0x8   : > { %147 = sbr.rel (%p144_p3) target bundleno = 419 (0x1a3), region = 28 }
   0xf   : > { %s174_s14 = scalar_select %p173_p4, %s654_s9, 1 }
  0x10   : > { %196 = sbr.rel (!%p191_p5) target bundleno = 23 (0x17), region = 32  ;;  %v197_v0 = vlaneseq (%p191_p5)  ;;  %v664_v1 = vmov (%p191_p5), 0.0  }
  0x11   : > { %s570_s15 = sshll.u32 %s174_s14, 3  ;;  %s561_s16 = sshll.u32 %s174_s14, 1 }
  0x12   : > { %s180_s19 = scalar_lea.vmem %s785_s0, %s570_s15  ;;  %s189_s22 = scalar_lea.vmem %s786_s1, %s561_s16  ;;  %vm199_vm0 = vcmp.lt.s32.totalorder (%p191_p5), %v197_v0, 256 }
  0x13   : > { %201 = vst.msk [vmem:[#allocation2] sm:$0x3] (%p191_p5), %vm199_vm0, %v664_v1  ;;  %202 = vst.msk [vmem:[#allocation3] sm:$0x3] (%p191_p5), %vm199_vm0, %v664_v1 }
  0x14   : > { %203 = vst.msk [vmem:[#allocation4] sm:$0x3] (%p191_p5), %vm199_vm0, %v664_v1 }
  0x17 PF: > { %v204_v2 = vld [vmem:[%s180_s19] sm:$0xff]  ;;  %vm209_vm1 = vcmask 1043456   ;;  %v255_v3 = vlaneseq  ;;  %p391_p6 = scmp.eq.s32.totalorder %s654_s9, 1  ;;  %v665_v20 = vmov 0.0   ;;  %v666_v33 = vmov 1966171168  }
  0x18   : > { %v207_v4 = vcombine.high %v204_v2, %v204_v2  ;;  %v210_v5 = vsel %vm209_vm1, %v204_v2, -inf  ;;  %v205_v8 = vld [vmem:[%s189_s22] sm:$0x3]  ;;  %v298_v34 = vunpack.c.l.s4 %v666_v33  ;;  %vm408_vm5 = vcmask (%p391_p6), 1040384  }
  0x19   : > { %v211_v6 = vrot.slane %v210_v5, 4  ;;  %v256_v7 = vshrl.u32 %v255_v3, 7  ;;  %vm728_vm4 = vcmp.lt.s32.totalorder %v255_v3, 256 }
  0x1a   : > { %v217_v9 = vsel %vm209_vm1, %v207_v4, -inf  ;;  %v299_v41 = vunpack.c.0.s8 %v298_v34 }
  0x1b   : > { %v212_v10 = vmax.f32 %v210_v5, %v211_v6  ;;  %v218_v11 = vrot.slane %v217_v9, 4  ;;  %v716_v12 = vsub.s32 0, %v256_v7  ;;  %v718_v13 = vsub.s32 1, %v256_v7  ;;  %v356_v51 = vld [vmem:[#allocation4] sm:$0x3] }
  0x1c   : > { %v724_v47 = vsub.s32 %v299_v41, %v256_v7 }
  0x1d   : > { %v213_v14 = vrot.slane %v212_v10, 2  ;;  %v219_v15 = vmax.f32 %v217_v9, %v218_v11  ;;  %v260_v16 = vrot.slane %v205_v8, %v716_v12  ;;  %v264_v17 = vrot.slane %v205_v8, %v718_v13 }
  0x1f   : > { %v214_v18 = vmax.f32 %v212_v10, %v213_v14  ;;  %v220_v19 = vrot.slane %v219_v15, 2  ;;  %vm265_vm2 = vcmp.eq.s32.totalorder %v256_v7, %v260_v16  ;;  %vm266_vm3 = vcmp.eq.s32.totalorder %v256_v7, %v264_v17 }
  0x20   : > { %v563_v21 = vsel %vm265_vm2, 1.0, %v665_v20  ;;  %v564_v24 = vsel %vm266_vm3, 1.0, %v665_v20 }
  0x21   : > { %v215_v22 = vrot.slane %v214_v18, 1  ;;  %v221_v23 = vmax.f32 %v219_v15, %v220_v19  ;;  %v357_v25 = vsel %vm209_vm1, %v563_v21, 0.0  ;;  %v364_v27 = vsel %vm209_vm1, %v564_v24, 0.0 }
  0x22   : > { %v358_v26 = vrot.slane %v357_v25, 4  ;;  %v365_v30 = vrot.slane %v364_v27, 4  ;;  %v274_v10 = vcombine.low %v563_v21, %v564_v24 }
  0x23   : > { %v216_v28 = vmax.f32 %v214_v18, %v215_v22  ;;  %v222_v29 = vrot.slane %v221_v23, 1 }
  0x24   : > { %v359_v31 = vadd.f32 %v358_v26, %v357_v25  ;;  %v366_v35 = vadd.f32 %v365_v30, %v364_v27 }
  0x25   : > { %v223_v32 = vmax.f32 %v221_v23, %v222_v29 }
  0x26   : > { %v360_v36 = vrot.slane %v359_v31, 2  ;;  %v367_v38 = vrot.slane %v366_v35, 2 }
  0x27   : > { %v226_v37 = vcombine.low %v216_v28, %v223_v32 }
  0x28   : > { %v361_v39 = vadd.f32 %v360_v36, %v359_v31  ;;  %v368_v42 = vadd.f32 %v367_v38, %v366_v35 }
  0x29   : > { %v228_v40 = vsub.f32 %v204_v2, %v226_v37 }
  0x2a   : > { %v362_v43 = vrot.slane %v361_v39, 1  ;;  %v369_v45 = vrot.slane %v368_v42, 1 }
  0x2b   : > { %v229_v44 = vmul.f32 1.442695, %v228_v40 }
  0x2c   : > { %v363_v46 = vadd.f32 %v362_v43, %v361_v39  ;;  %v370_v48 = vadd.f32 %v369_v45, %v368_v42 }
  0x2d   : > { %616 = vpow2.f32 %v229_v44 }
  0x2e   : > { %v373_v49 = vcombine.low %v363_v46, %v370_v48 }
  0x30   : > { %v380_v50 = vrot.slane %v373_v49, %v724_v47  ;;  %v318_v49 = vld [vmem:[#allocation3] sm:$0x3] }
  0x32   : > { %v387_v52 = vrot.slane %v380_v50, %v724_v47 }
  0x34   : > { %v389_v54 = vadd.f32 %v387_v52, %v356_v51  ;;  %v271_v52 = vld [vmem:[#allocation2] sm:$0x3] }
  0x36   : > { %390 = vst.msk [vmem:[#allocation4] sm:$0x3] %vm728_vm4, %v389_v54 }
  0x37   : > { %v617_v55 = vpop.eup %616 }
  0x38   : > { %v232_v56 = vcombine.high %v617_v55, %v617_v55  ;;  %v234_v57 = vsel %vm209_vm1, %v617_v55, 0.0 }
  0x39   : > { %v235_v58 = vrot.slane %v234_v57, 4 }
  0x3a   : > { %v241_v59 = vsel %vm209_vm1, %v232_v56, 0.0 }
  0x3b   : > { %v236_v60 = vadd.f32 %v235_v58, %v234_v57  ;;  %v242_v61 = vrot.slane %v241_v59, 4 }
  0x3d   : > { %v237_v62 = vrot.slane %v236_v60, 2  ;;  %v243_v63 = vadd.f32 %v242_v61, %v241_v59  ;;  %v445_v57 = vld [vmem:[#allocation4] sm:$0x3] (%p391_p6) }
  0x3e   : > { %v450_v59 = vrot.slane (%p391_p6), %v445_v57, %v716_v12 }
  0x3f   : > { %v238_v0 = vadd.f32 %v237_v62, %v236_v60  ;;  %v244_v1 = vrot.slane %v243_v63, 2  ;;  %v454_v60 = vrot.slane (%p391_p6), %v445_v57, %v718_v13 }
  0x41   : > { %v239_v2 = vrot.slane %v238_v0, 1  ;;  %v245_v3 = vadd.f32 %v244_v1, %v243_v63  ;;  %v458_v1 = vsel (%p391_p6), %vm408_vm5, %v454_v60, 0.0 }
  0x43   : > { %v240_v4 = vadd.f32 %v239_v2, %v238_v0  ;;  %v246_v5 = vrot.slane %v245_v3, 1  ;;  %v457_v0 = vsel (%p391_p6), %vm408_vm5, %v450_v59, 0.0 }
  0x45   : > { %v247_v6 = vadd.f32 %v246_v5, %v245_v3  ;;  %618 = vrcp.f32 %v240_v4  ;;  %v459_v4 = vadd.f32 (%p391_p6), %v458_v1, %v457_v0 }
  0x47   : > { %620 = vrcp.f32 %v247_v6  ;;  %460 = vadd.xlane.f32.xlu1 (%p391_p6), %v459_v4 }
  0x4f   : > { %v619_v7 = vpop.eup %618 }
  0x51   : > { %v621_v8 = vpop.eup %620 }
  0x52   : > { %v252_v9 = vcombine.low %v619_v7, %v621_v8 }
  0x54   : > { %v254_v11 = vmul.f32 %v617_v55, %v252_v9 }
  0x56   : > { %v276_v14 = vmul.f32 %v274_v10, %v254_v11  ;;  %v320_v15 = vcombine.high %v254_v11, %v254_v11  ;;  %v322_v16 = vsel %vm209_vm1, %v254_v11, 0.0 }
  0x57   : > { %v323_v17 = vrot.slane %v322_v16, 4 }
  0x58   : > { %v278_v18 = vcombine.high %v276_v14, %v276_v14  ;;  %v280_v19 = vsel %vm209_vm1, %v276_v14, 0.0  ;;  %v329_v20 = vsel %vm209_vm1, %v320_v15, 0.0 }
  0x59   : > { %v281_v22 = vrot.slane %v280_v19, 4  ;;  %v324_v23 = vadd.f32 %v323_v17, %v322_v16  ;;  %v330_v25 = vrot.slane %v329_v20, 4 }
  0x5a   : > { %v287_v26 = vsel %vm209_vm1, %v278_v18, 0.0 }
  0x5b   : > { %v282_v27 = vadd.f32 %v281_v22, %v280_v19  ;;  %v288_v28 = vrot.slane %v287_v26, 4  ;;  %v325_v29 = vrot.slane %v324_v23, 2  ;;  %v331_v21 = vadd.f32 %v330_v25, %v329_v20 }
  0x5d   : > { %v283_v24 = vrot.slane %v282_v27, 2  ;;  %v289_v30 = vadd.f32 %v288_v28, %v287_v26  ;;  %v326_v31 = vadd.f32 %v325_v29, %v324_v23  ;;  %v332_v32 = vrot.slane %v331_v21, 2 }
  0x5f   : > { %v284_v33 = vadd.f32 %v283_v24, %v282_v27  ;;  %v290_v34 = vrot.slane %v289_v30, 2  ;;  %v327_v35 = vrot.slane %v326_v31, 1  ;;  %v333_v36 = vadd.f32 %v332_v32, %v331_v21 }
  0x61   : > { %v285_v37 = vrot.slane %v284_v33, 1  ;;  %v291_v38 = vadd.f32 %v290_v34, %v289_v30  ;;  %v328_v39 = vadd.f32 %v327_v35, %v326_v31  ;;  %v334_v40 = vrot.slane %v333_v36, 1 }
  0x63   : > { %v286_v41 = vadd.f32 %v285_v37, %v284_v33  ;;  %v292_v42 = vrot.slane %v291_v38, 1  ;;  %v335_v43 = vadd.f32 %v334_v40, %v333_v36 }
  0x65   : > { %v293_v44 = vadd.f32 %v292_v42, %v291_v38  ;;  %v338_v45 = vcombine.low %v328_v39, %v335_v43 }
  0x67   : > { %v296_v46 = vcombine.low %v286_v41, %v293_v44  ;;  %v345_v48 = vrot.slane %v338_v45, %v724_v47 }
  0x69   : > { %v303_v50 = vrot.slane %v296_v46, %v724_v47  ;;  %v352_v51 = vrot.slane %v345_v48, %v724_v47  ;;  %395 = sbr.rel (!%p391_p6) target bundleno = 404 (0x194), region = 36 }
  0x6b   : > { %v310_v54 = vrot.slane %v303_v50, %v724_v47  ;;  %v354_v55 = vadd.f32 %v352_v51, %v318_v49 }
  0x6d   : > { %v312_v56 = vadd.f32 %v310_v54, %v271_v52  ;;  %355 = vst.msk [vmem:[#allocation3] sm:$0x3] %vm728_vm4, %v354_v55 }
  0x6f   : > { %317 = vst.msk [vmem:[#allocation2] sm:$0x3] %vm728_vm4, %v312_v56 }
  0x74   : > { %v421_v62 = vld [vmem:[#allocation3] sm:$0x3] }
  0x75   : > { %v426_v63 = vrot.slane %v421_v62, %v716_v12  ;;  %v430_v53 = vrot.slane %v421_v62, %v718_v13 }
  0x76   : > { %v396_v58 = vld [vmem:[#allocation2] sm:$0x3] }
  0x77   : > { %v401_v47 = vrot.slane %v396_v58, %v716_v12  ;;  %v405_v61 = vrot.slane %v396_v58, %v718_v13  ;;  %v433_v6 = vsel %vm408_vm5, %v426_v63, 0.0  ;;  %v434_v7 = vsel %vm408_vm5, %v430_v53, 0.0 }
  0x78   : > { %v435_v8 = vadd.f32 %v434_v7, %v433_v6 }
  0x79   : > { %v409_v2 = vsel %vm408_vm5, %v401_v47, 0.0  ;;  %v410_v3 = vsel %vm408_vm5, %v405_v61, 0.0 }
  0x7a   : > { %v411_v5 = vadd.f32 %v410_v3, %v409_v2 }
  0x7c   : > { %412 = vadd.xlane.f32.xlu0 %v411_v5 }
  0x80   : > { %436 = vadd.xlane.f32.xlu0 %v435_v8 }
  0xd4   : > { %v461_v12 = vpop.xlane.xlu1 %460 }
  0xd5   : > { %v462_v9 = vrot.slane %v461_v12, 4 }
  0xd7   : > { %v463_v11 = vadd.f32 %v462_v9, %v461_v12 }
  0xd9   : > { %v464_v16 = vrot.slane %v463_v11, 2 }
  0xdb   : > { %v465_v22 = vadd.f32 %v464_v16, %v463_v11 }
  0xdd   : > { %v466_v28 = vrot.slane %v465_v22, 1 }
  0xdf   : > { %v467_v24 = vadd.f32 %v466_v28, %v465_v22 }
 0x109   : > { %v413_v13 = vpop.xlane.xlu0 %412 }
 0x10a   : > { %v414_v10 = vrot.slane %v413_v13, 4 }
 0x10c   : > { %v415_v14 = vadd.f32 %v414_v10, %v413_v13 }
 0x10d   : > { %v437_v15 = vpop.xlane.xlu0 %436 }
 0x10e   : > { %v416_v17 = vrot.slane %v415_v14, 2  ;;  %v438_v18 = vrot.slane %v437_v15, 4 }
 0x110   : > { %v439_v19 = vadd.f32 %v438_v18, %v437_v15  ;;  %v417_v20 = vadd.f32 %v416_v17, %v415_v14 }
 0x112   : > { %v440_v23 = vrot.slane %v439_v19, 2  ;;  %v418_v25 = vrot.slane %v417_v20, 1 }
 0x114   : > { %v441_v26 = vadd.f32 %v440_v23, %v439_v19  ;;  %v419_v27 = vadd.f32 %v418_v25, %v417_v20 }
 0x116   : > { %573 = vpush %v419_v27  ;;  %v442_v29 = vrot.slane %v441_v26, 1 }
 0x118   : > { %v443_v21 = vadd.f32 %v442_v29, %v441_v26 }
 0x11a   : > { %575 = vpush %v443_v21 }
 0x11b   : > { %577 = vpush %v467_v24 }
 0x147   : > { %s574_s23 = spop %573 }
 0x148   : > { %s471_s28 = smul.f32 2.0, %s574_s23 }
 0x14a   : > { %s472_s29 = sadd.f32 1.0, %s471_s28 }
 0x14b   : > { %s576_s24 = spop %575 }
 0x14c   : > { %s578_s25 = spop %577 }
 0x14d   : > { %s469_s26 = sadd.f32 %s578_s25, %s576_s24 }
 0x14f   : > { %s470_s27 = sadd.f32 1.0, %s469_s26 }
 0x151   : > { %v473_v30 = vstv %s470_s27 }
 0x152   : > { %622 = vrcp.f32 %v473_v30 }
 0x15c   : > { %v623_v31 = vpop.eup %622 }
 0x15d   : > { %579 = vpush %v623_v31 }
 0x18e   : > { %s580_s30 = spop %579 }
 0x18f   : > { %s476_s3 = smul.f32 %s580_s30, %s472_s29 }
 0x191   : > { %s477_s4 = ssub.f32 1.0, %s476_s3 }
 0x193   : > { %479 = sst [smem:[#allocation5]] %s477_s4 }
 0x194 PF: > { %p585_p7 = scmp.eq.s32.totalorder %s555_s12, 1  ;;  %s624_s7 = scalar_lea.hbm %s787_s2, 16 }
 0x195   : > { %p625_p8 = scmp.ne.s32.totalorder %s787_s2, %s624_s7  ;;  %p630_p11 = scmp.lt.u32.totalorder %s624_s7, %s787_s2 }
 0x197   : > { %p626_p9 = pnand %p625_p8, %p585_p7 }
 0x199   : > { %p627_p10 = pneg %p626_p9 }
 0x19b   : > { %p632_p12 = pnand %p630_p11, %p627_p10 }
 0x19d   : > { %635 = shalt.err (!%p632_p12)
}
 0x19e   : > { %s667_s16 = smov [#allocation5]  }
 0x19f   : > { %582 = dma.smem_to_hbm (%p585_p7), %s667_s16, 16, %s787_s2, [#allocation6]  }
 0x1a0   : > { %649 = dma.done.wait (%p585_p7), [#allocation6], 16  }
 0x1a1   : > { %651 = vsyncadd (%p585_p7), [#allocation6], 4294967280 }
 0x1a2   : > { %493 = sfence }
 0x1a3 PF: > { %s13_s11 = sadd.s32 1, %s662_s11   ;;  %s790_s9 = smov %s658_s10 }
 0x1a4   : > { %p10_p13 = scmp.ge.s32.totalorder %s13_s11, 4   ;;  %s791_s10 = smov %s793_s13 }
 0x1a6   :  { %12 = sbr.rel (!%p10_p13) target bundleno = 2 (0x2), region = 67 }
 0x1ad   :  { %499 = vsyncpa [#allocation6], 1 }
 0x1ae   :  { %501 = vsyncpa [#allocation6 + $0x1], 1 }

</bundles_post_ra>
